<compile_context>
chip_gen: v5e
topology: v5e:2x2
jax: 0.10.0
libtpu: 0.0.40
codegen_flags: <defaults>
</compile_context>

<pallas_src>
import functools

import numpy as np
import jax
import jax.numpy as jnp
from jax.experimental import pallas as pl
from jax.experimental.pallas import tpu as pltpu


# ---------------------------------------------------------------------------
# Host-side, cached setup:  A = inv(I + lamb * D^T D).  Depends only on (T, lamb).
# ---------------------------------------------------------------------------
def _d_matrix_np(N):
    D = np.zeros((N - 1, N), dtype=np.float64)
    D[:, 1:] += np.eye(N - 1)
    D[:, :-1] -= np.eye(N - 1)
    return D


@functools.lru_cache(maxsize=None)
def _hp_matrix_np(T, lamb):
    # TODO(synk): torch.inverse matched exactly; a banded/Cholesky solve would
    # be more stable for very large T / lamb, but we keep the explicit inverse
    # to match the reference.  The O(T^3) inverse runs once per (T, lamb).
    D = _d_matrix_np(T - 1) @ _d_matrix_np(T)
    A = np.linalg.inv(np.eye(T) + float(lamb) * (D.T @ D))
    return np.asarray(A, dtype=np.float32)


# ---------------------------------------------------------------------------
# Kernel: one (tT, C) output tile = A[rows] @ x[b]^T  (+ residual).
# ---------------------------------------------------------------------------
def _hp_kernel(a_ref, x_ref, res_ref, trend_ref, xt_f32, xt_bf16,
               *, block_t, a_resident):
    # a_ref     : (T, T) bf16 (resident)  OR  (block_t, T) bf16 (streamed tile)
    # x_ref     : (C, T) f32   one batch element's slab, native NCW layout
    # res_ref   : (block_t, C) f32   residual tile
    # trend_ref : (block_t, C) f32   trend tile
    # xt_f32    : (T, C) f32   scratch: transposed x (exact residual source)
    # xt_bf16   : (T, C) bf16  scratch: bf16 copy feeding the MXU
    j = pl.program_id(1)

    # Transpose this batch element's slab once (row axis is "arbitrary", so
    # j == 0 is guaranteed to run before the other row tiles of this batch).
    @pl.when(j == 0)
    def _():
        xt = x_ref[...].T                       # (C, T) -> (T, C), XLU
        xt_f32[...] = xt
        xt_bf16[...] = xt.astype(jnp.bfloat16)

    row0 = pl.multiple_of(j * block_t, block_t)
    if a_resident:
        a_rows = a_ref[pl.ds(row0, block_t), :]   # slice resident A
    else:
        a_rows = a_ref[...]                        # streamed row tile

    # MXU matmul: (tT, T) bf16 x (T, C) bf16 -> (tT, C), f32 accumulate.
    g = jnp.dot(a_rows, xt_bf16[...], preferred_element_type=jnp.float32)

    trend_ref[...] = g.astype(trend_ref.dtype)
    # Residual in f32 against the original (f32) x so res + trend == x.
    res_ref[...] = (xt_f32[pl.ds(row0, block_t), :] - g).astype(res_ref.dtype)


# ---------------------------------------------------------------------------
# VMEM-budget-aware planning (48 MiB target fits v7x's 64 MiB per-TC VMEM).
# ---------------------------------------------------------------------------
_VMEM_TARGET_BYTES = 48 << 20


def _estimate_vmem(T, C, tT, a_resident):
    a = 2 * (T * T if a_resident else tT * T) * 2     # bf16 A, double-buffered
    x = 2 * C * T * 4                                 # f32 input slab, 2 bufs
    scr = T * C * (4 + 2)                             # f32 + bf16 scratches
    out = 2 * 2 * tT * C * 4                          # two f32 outputs, 2 bufs
    return a + x + scr + out


def _plan(T, C, block_t=None, force_stream_a=False,
          vmem_target=_VMEM_TARGET_BYTES):
    """Pick (row_tile, a_resident, est_bytes)."""
    if block_t is not None:
        assert T % block_t == 0, "block_t must divide T"
        cands = [block_t]
    else:
        # Prefer 512/256 (fills the 256-wide MXU on v6e/v7x); 128 and below
        # only when T forces it.  v5e is happy with any of these.
        cands = [t for t in (512, 256, 128, 64, 32, 16, 8) if T % t == 0] or [T]
    residency = (False,) if force_stream_a else (True, False)
    for resident in residency:
        for tT in cands:
            est = _estimate_vmem(T, C, tT, resident)
            if est <= vmem_target:
                return tT, resident, est
    tT = cands[-1]
    return tT, False, _estimate_vmem(T, C, tT, False)


# ---------------------------------------------------------------------------
# Public wrapper.
# ---------------------------------------------------------------------------
def hp_filter_forward(x, lamb=6400.0, block_t=None, force_stream_a=False):
    """Pallas hp_filter.forward.

    x: (B, C, T) float array (PyTorch NCW layout).
    Returns (res, trend), each (B, T, C), matching the reference's (res, g).
    Precision contract: outputs are f32; the residual subtraction is exact in
    f32 against the (f32) input, so res + trend reconstructs x.
    """
    B, C, T = x.shape
    # Cached host setup; bf16 A halves the dominant HBM stream and is
    # MXU-native on all generations.  Accumulation stays f32.
    A = jnp.asarray(_hp_matrix_np(T, float(lamb))).astype(jnp.bfloat16)
    x = x.astype(jnp.float32)                 # f32 residual-path contract

    tT, a_resident, est = _plan(T, C, block_t, force_stream_a)
    n_rows = T // tT
    grid = (B, n_rows)

    if a_resident:
        # Constant index map -> A is DMA'd once and stays VMEM-resident.
        a_spec = pl.BlockSpec((T, T), lambda b, j: (0, 0))
    else:
        # Large-T fallback: stream A in row tiles (double-buffered).
        a_spec = pl.BlockSpec((tT, T), lambda b, j: (j, 0))
    # x[b] in native (C, T) layout; index changes only with b, so the slab
    # stays resident across the row tiles of one batch element.
    x_spec = pl.BlockSpec((None, C, T), lambda b, j: (b, 0, 0))

    vmem_limit = int(min(64 << 20, max(32 << 20, est * 5 // 4 + (2 << 20))))

    cost = pl.CostEstimate(
        flops=2 * B * T * T * C,
        transcendentals=0,
        bytes_accessed=T * T * 2 + B * C * T * 4 + 2 * B * T * C * 4,
    )

    kernel = functools.partial(_hp_kernel, block_t=tT, a_resident=a_resident)
    res, trend = pl.pallas_call(
        kernel,
        out_shape=(jax.ShapeDtypeStruct((B, T, C), jnp.float32),
                   jax.ShapeDtypeStruct((B, T, C), jnp.float32)),
        grid=grid,
        in_specs=[a_spec, x_spec],
        out_specs=(
            pl.BlockSpec((None, tT, C), lambda b, j: (b, j, 0)),  # res
            pl.BlockSpec((None, tT, C), lambda b, j: (b, j, 0)),  # trend
        ),
        scratch_shapes=[
            pltpu.VMEM((T, C), jnp.float32),    # transposed x (exact)
            pltpu.VMEM((T, C), jnp.bfloat16),   # transposed x (MXU feed)
        ],
        compiler_params=pltpu.CompilerParams(
            # Batch axis parallel (megacore sharding); row axis "arbitrary"
            # because of the once-per-batch transpose at j == 0.
            dimension_semantics=("parallel", "arbitrary"),
            vmem_limit_bytes=vmem_limit),
        cost_estimate=cost,
    )(A, x)
    return res, trend


if __name__ == "__main__":
    key = jax.random.PRNGKey(0)
    B, C, T = 2, 256, 128
    lamb = 6400.0
    x = jax.random.normal(key, (B, C, T), jnp.float32)

    # Default plan: resident bf16 A, large row tile.
    res, trend = hp_filter_forward(x, lamb)
    jax.block_until_ready((res, trend))

    # Also exercise the streamed-A fallback path (used when T is very large).
    res_s, trend_s = hp_filter_forward(x, lamb, block_t=64, force_stream_a=True)
    jax.block_until_ready((res_s, trend_s))

    # Plain-JAX reference (same math as hp_filter.forward).
    A_ref = jnp.asarray(_hp_matrix_np(T, lamb))
    x_t = jnp.transpose(x, (0, 2, 1))
    g_ref = jnp.einsum("ij,bjc->bic", A_ref, x_t,
                       precision=jax.lax.Precision.HIGHEST)
    res_ref = x_t - g_ref

    for r, g in ((res, trend), (res_s, trend_s)):
        assert r.shape == (B, T, C) and g.shape == (B, T, C)
        assert jnp.allclose(g, g_ref, atol=1e-2, rtol=1e-2)
        assert jnp.allclose(r, res_ref, atol=1e-2, rtol=1e-2)
        # HP decomposition identity: res + trend reconstructs the (permuted) x.
        assert jnp.allclose(r + g, x_t, atol=1e-4)
    print("KERNEL_OK")
</pallas_src>

<mosaic_0001>
module attributes {stable_mosaic.version = 11 : i64} {
  func.func @_hp_kernel(%arg0: i32, %arg1: i32, %arg2: memref<128x128xbf16, #tpu.memory_space<vmem>>, %arg3: memref<1x256x128xf32, #tpu.memory_space<vmem>>, %arg4: memref<1x128x256xf32, #tpu.memory_space<vmem>>, %arg5: memref<1x128x256xf32, #tpu.memory_space<vmem>>, %arg6: memref<128x256xf32, #tpu.memory_space<vmem>>, %arg7: memref<128x256xbf16, #tpu.memory_space<vmem>>) attributes {dimension_semantics = [#tpu.dimension_semantics<parallel>, #tpu.dimension_semantics<arbitrary>], iteration_bounds = array<i64: 2, 1>, scalar_prefetch = 0 : i64, scratch_operands = 2 : i64, tpu.core_type = #tpu.core_type<tc>, window_params = [{pipeline_mode = #tpu.pipeline_mode<synchronous>, transform_indices = @transform_0, window_bounds = array<i64: 128, 128>}, {transform_indices = @transform_1, window_bounds = array<i64: 1, 256, 128>}, {transform_indices = @transform_2, window_bounds = array<i64: 1, 128, 256>}, {transform_indices = @transform_3, window_bounds = array<i64: 1, 128, 256>}]} {
    %c0_i32 = arith.constant 0 : i32
    %0 = arith.cmpi eq, %arg1, %c0_i32 : i32
    %1 = arith.extui %0 : i1 to i32
    %c0_i32_0 = arith.constant 0 : i32
    %2 = arith.cmpi ne, %1, %c0_i32_0 : i32
    scf.if %2 {
      %c0_10 = arith.constant 0 : index
      %c0_11 = arith.constant 0 : index
      %c0_12 = arith.constant 0 : index
      %18 = vector.load %arg3[%c0_10, %c0_11, %c0_12] : memref<1x256x128xf32, #tpu.memory_space<vmem>>, vector<1x256x128xf32>
      %19 = vector.shape_cast %18 : vector<1x256x128xf32> to vector<256x128xf32>
      %20 = tpu.transpose %19, [1, 0] : vector<256x128xf32> -> vector<128x256xf32>
      %c0_13 = arith.constant 0 : index
      %c0_14 = arith.constant 0 : index
      %21 = vector.load %arg6[%c0_13, %c0_14] : memref<128x256xf32, #tpu.memory_space<vmem>>, vector<128x256xf32>
      tpu.vector_store %arg6[%c0_13, %c0_14], %20 {strides = array<i32>} : memref<128x256xf32, #tpu.memory_space<vmem>>, vector<128x256xf32>,
      %22 = arith.truncf %20 : vector<128x256xf32> to vector<128x256xbf16>
      %c0_15 = arith.constant 0 : index
      %c0_16 = arith.constant 0 : index
      %23 = vector.load %arg7[%c0_15, %c0_16] : memref<128x256xbf16, #tpu.memory_space<vmem>>, vector<128x256xbf16>
      tpu.vector_store %arg7[%c0_15, %c0_16], %22 {strides = array<i32>} : memref<128x256xbf16, #tpu.memory_space<vmem>>, vector<128x256xbf16>,
    } else {
    }
    %c128_i32 = arith.constant 128 : i32
    %3 = arith.muli %arg1, %c128_i32 : i32
    %4 = tpu.assume_multiple %3, 128 : i32
    %5 = arith.index_cast %4 : i32 to index
    %c0 = arith.constant 0 : index
    %6 = vector.load %arg2[%5, %c0] : memref<128x128xbf16, #tpu.memory_space<vmem>>, vector<128x128xbf16>
    %c0_1 = arith.constant 0 : index
    %c0_2 = arith.constant 0 : index
    %7 = vector.load %arg7[%c0_1, %c0_2] : memref<128x256xbf16, #tpu.memory_space<vmem>>, vector<128x256xbf16>
    %cst = arith.constant dense<0.000000e+00> : vector<128x256xf32>
    %8 = tpu.matmul %6, %7, %cst {dimension_numbers = #tpu.dot_dimension_numbers<[1], [0], [0], [1], [0, 0, 1, 1], [], []>} : vector<128x128xbf16>, vector<128x256xbf16>, vector<128x256xf32> -> vector<128x256xf32>
    %c0_3 = arith.constant 0 : index
    %c0_4 = arith.constant 0 : index
    %c0_5 = arith.constant 0 : index
    %9 = vector.load %arg5[%c0_3, %c0_4, %c0_5] : memref<1x128x256xf32, #tpu.memory_space<vmem>>, vector<1x128x256xf32>
    %10 = vector.shape_cast %9 : vector<1x128x256xf32> to vector<128x256xf32>
    %11 = vector.shape_cast %8 : vector<128x256xf32> to vector<1x128x256xf32>
    tpu.vector_store %arg5[%c0_3, %c0_4, %c0_5], %11 {strides = array<i32>} : memref<1x128x256xf32, #tpu.memory_space<vmem>>, vector<1x128x256xf32>,
    %12 = arith.index_cast %4 : i32 to index
    %c0_6 = arith.constant 0 : index
    %13 = vector.load %arg6[%12, %c0_6] : memref<128x256xf32, #tpu.memory_space<vmem>>, vector<128x256xf32>
    %14 = arith.subf %13, %8 : vector<128x256xf32>
    %c0_7 = arith.constant 0 : index
    %c0_8 = arith.constant 0 : index
    %c0_9 = arith.constant 0 : index
    %15 = vector.load %arg4[%c0_7, %c0_8, %c0_9] : memref<1x128x256xf32, #tpu.memory_space<vmem>>, vector<1x128x256xf32>
    %16 = vector.shape_cast %15 : vector<1x128x256xf32> to vector<128x256xf32>
    %17 = vector.shape_cast %14 : vector<128x256xf32> to vector<1x128x256xf32>
    tpu.vector_store %arg4[%c0_7, %c0_8, %c0_9], %17 {strides = array<i32>} : memref<1x128x256xf32, #tpu.memory_space<vmem>>, vector<1x128x256xf32>,
    return
  }
  func.func @transform_0(%arg0: i32, %arg1: i32) -> (i32, i32) {
    %c0_i32 = arith.constant 0 : i32
    %c0_i32_0 = arith.constant 0 : i32
    %c0_i32_1 = arith.constant 0 : i32
    return %c0_i32, %c0_i32_0 : i32, i32
  }
  func.func @transform_1(%arg0: i32, %arg1: i32) -> (i32, i32, i32) {
    %c0_i32 = arith.constant 0 : i32
    %c0_i32_0 = arith.constant 0 : i32
    %c0_i32_1 = arith.constant 0 : i32
    return %arg0, %c0_i32, %c0_i32_0 : i32, i32, i32
  }
  func.func @transform_2(%arg0: i32, %arg1: i32) -> (i32, i32, i32) {
    %c0_i32 = arith.constant 0 : i32
    %c0_i32_0 = arith.constant 0 : i32
    return %arg0, %arg1, %c0_i32 : i32, i32, i32
  }
  func.func @transform_3(%arg0: i32, %arg1: i32) -> (i32, i32, i32) {
    %c0_i32 = arith.constant 0 : i32
    %c0_i32_0 = arith.constant 0 : i32
    return %arg0, %arg1, %c0_i32 : i32, i32, i32
  }
}

</mosaic_0001>

<bundles_post_ra>
// kernel: tpu_custom_call.1
= control target key start
LH: loop header
LB: loop body
LE: loop exit
PB: predicated region body
PF: predicated region fallthrough
CT: control target
= control target key end

     0   :  { %s1836_s0 = inlined_call_operand.hbm [shape: bf16[128,128], index: 0, kind: input, shape index: {}]   ;;  %s1837_s1 = inlined_call_operand.hbm [shape: f32[2,256,128], index: 1, kind: input, shape index: {}]   ;;  %s1838_s2 = inlined_call_operand.hbm [shape: f32[2,128,256], index: 2, kind: output, shape index: {0}]   ;;  %s1839_s3 = inlined_call_operand.hbm [shape: f32[2,128,256], index: 3, kind: output, shape index: {1}]  }
   0x1   :  { %1840 = sst [smem:[#allocation16_spill]] %s1836_s0 }
   0x2   :  { %9 = vsyncpa [#allocation5], 0 }
   0x3   :  { %10 = vsyncpa [#allocation8], 0 }
   0x4   :  { %12 = vsyncpa [#allocation8 + $0x1], 0 }
   0x5   :  { %13 = vsyncpa [#allocation6], 0 }
   0x6   :  { %15 = vsyncpa [#allocation6 + $0x1], 0 }
   0x7   :  { %16 = vsyncpa [#allocation11], 0 }
   0x8   :  { %18 = vsyncpa [#allocation11 + $0x1], 0  ;;  %s1426_s12 = smov 0   ;;  %s1428_s13 = smov 0  }
   0x9   :  { %s1430_s14 = smov 0   ;;  %s1432_s15 = smov 0  }
   0xa   :  { %s1434_s16 = smov 0   ;;  %s1436_s17 = smov 0  }
   0xb LB: > { %s975_s18 = sadd.s32 4294967295, %s1397_s17   ;;  %s976_s19 = sadd.s32 4294967294, %s1397_s17   ;;  %s1397_s17 = sphi %s1436_s17, %s24_s17   ;;  %s1393_s16 = sphi %s1434_s16, %s1853_s16   ;;  %s1389_s15 = sphi %s1432_s15, %s1852_s15   ;;  %s1385_s14 = sphi %s1430_s14, %s1851_s14   ;;  %s1381_s13 = sphi %s1428_s13, %s1850_s13   ;;  %s1377_s12 = sphi %s1426_s12, %s1849_s12  }
   0xc   : > { %p77_p0 = scmp.ne.s32.totalorder %s1381_s13, %s1377_s12  ;;  %p1460_p1 = scmp.eq.s32.totalorder %s975_s18, 0 }
   0xd   : > { %p1464_p2 = scmp.eq.s32.totalorder %s975_s18, 1  ;;  %p109_p3 = scmp.eq.s32.totalorder %s976_s19, 1 }
   0xe   : > { %p1470_p4 = por %p1460_p1, %p77_p0  ;;  %p977_p5 = scmp.ge.s32.totalorder %s1397_s17, 1 }
   0xf   : > { %p1475_p6 = por %p109_p3, %p77_p0  ;;  %p144_p7 = scmp.lt.s32.totalorder %s1397_s17, 3 }
  0x10   : > { %s1845_s0 = sld [smem:[#allocation16_spill]]  ;;  %s1399_s28 = smov [#allocation4]  }
  0x11   : > { %p1483_p8 = pnand %p977_p5, %p144_p7  ;;  %s157_s29 = sshll.u32 %s1399_s28, 4  ;;  %s158_s29 = int_to_ptr.vmem [resolvable:$true] %s157_s29 }
  0x12   : > { %p979_p11 = scmp.ge.s32.totalorder %s1397_s17, 2  ;;  %s1400_s30 = smov 64  }
  0x13   : > { %p1145_p9 = pneg %p1483_p8  ;;  %s1401_s4 = smov 4  }
  0x14   : > { %s36_s5 = sadd.s32 1, %s1393_s16  ;;  %s64_s6 = sadd.s32 1, %s1385_s14 }
  0x15   : > { %p1146_p10 = pnand %p1145_p9, %p1460_p1  ;;  %p38_p12 = scmp.ge.s32.totalorder %s36_s5, 2 }
  0x16   : > { %s155_s26 = sshll.u32 %s1845_s0, 4  ;;  %p71_p13 = scmp.ne.s32.totalorder %s1385_s14, %s1381_s13  ;;  %s156_s26 = int_to_ptr.hbm [resolvable:$true] %s155_s26 }
  0x17   : > { %1148 = dma.hbm_to_vmem [thread:$0]  (!%p1146_p10), %s156_s26, 1024, %s158_s29, [#allocation5], %s1400_s30, %s1400_s30, %s1401_s4  }
  0x18   : > { %p72_p0 = scmp.eq.s32.totalorder %s1397_s17, 0  ;;  %s1855_s5 = smov (%p38_p12, %s36_s5), 0 }
  0x19   : > { %p1505_p5 = por %p1464_p2, %p71_p13  ;;  %s61_s9 = ssub.s32 %s1393_s16, %s1855_s5 }
  0x1a   : > { %p1499_p3 = por %p72_p0, %p71_p13  ;;  %p1161_p7 = scmp.lt.s32.totalorder %s1397_s17, 2 }
  0x1b   : > { %p62_p9 = scmp.eq.s32.totalorder %s61_s9, 0  ;;  %s171_s10 = sand.u32 1, %s1385_s14  }
  0x1c   : > { %s980_s11 = sshll.u32 %s171_s10, 8  ;;  %s1092_s19 = sshll.u32 %s1393_s16, 8 }
  0x1d   : > { %s1514_s18 = scalar_select %p62_p9, %s1385_s14, %s64_s6  }
  0x1e   : > { %s180_s26 = scalar_lea.hbm %s1837_s1, %s1092_s19  ;;  %s175_s28 = scalar_lea.vmem [#allocation7], %s980_s11 }
  0x1f   : > { %s183_s29 = sshll.u32 %s175_s28, 4  ;;  %s181_s21 = sshll.u32 %s180_s26, 4  ;;  %s184_s29 = int_to_ptr.vmem [resolvable:$true] %s183_s29  ;;  %s182_s21 = int_to_ptr.hbm [resolvable:$true] %s181_s21 }
  0x20   : > { %p1150_p2 = pnand %p1161_p7, %p1499_p3  ;;  %s172_s30 = scalar_lea.sflag [#allocation8], %s171_s10 }
  0x21   : > { %s1402_s4 = smov 128   ;;  %s1403_s0 = smov 8  }
  0x22   : > { %1152 = dma.hbm_to_vmem [thread:$0]  (!%p1150_p2), %s182_s21, 4096, %s184_s29, %s172_s30, %s1402_s4, %s1402_s4, %s1403_s0  }
  0x23   : > { %195 = sbr.rel (%p1483_p8) target bundleno = 586 (0x24a), region = 28 }
  0x28   : > { %1360 = dma.done.wait (%p1460_p1), [#allocation5], 1024  }
  0x29   : > { %1362 = vsyncadd (%p1460_p1), [#allocation5], 4294966272  ;;  %s1529_s6 = sand.u32 1, %s1381_s13  }
  0x2a   : > { %s1532_s7 = sshll.u32 %s1529_s6, 8  ;;  %s203_s9 = scalar_lea.sflag [#allocation8], %s1529_s6 }
  0x2b   : > { %s1536_s0 = scalar_lea.vmem [#allocation7], %s1532_s7 }
  0x2c   : > { %1364 = dma.done.wait (%p1470_p4), %s203_s9, 4096  }
  0x2d   : > { %1366 = vsyncadd (%p1470_p4), %s203_s9, 4294963200  ;;  %v257_v0 = vld [vmem:[%s1536_s0 + $0x80] sm:$0xff]  ;;  %v258_v2 = vld [vmem:[%s1536_s0 + $0x88] sm:$0xff]  ;;  %s1671_s20 = scalar_lea.vmem [#allocation10], %s1532_s7  ;;  %s1678_s22 = scalar_lea.vmem [#allocation9], %s1532_s7 }
  0x2e   : > { %v241_v1 = vld [vmem:[%s1536_s0] sm:$0xff]  ;;  %305 = vxpose.xlu1.b32.start [1/16] %v257_v0, 128  ;;  %v242_v3 = vld [vmem:[%s1536_s0 + $0x8] sm:$0xff]  ;;  %v259_v4 = vld [vmem:[%s1536_s0 + $0x90] sm:$0xff]  ;;  %s1117_s27 = sshll.u32 %s1389_s15, 8  ;;  %s816_s19 = sshll.u32 %s1678_s22, 4  ;;  %s1773_s19 = int_to_ptr.vmem [resolvable:$true] %s816_s19 }
  0x2f   : > { %273 = vxpose.xlu0.b32.start [1/16] %v241_v1, 128  ;;  %v243_v5 = vld [vmem:[%s1536_s0 + $0x10] sm:$0xff]  ;;  %v260_v6 = vld [vmem:[%s1536_s0 + $0x98] sm:$0xff]  ;;  %v261_v8 = vld [vmem:[%s1536_s0 + $0xa0] sm:$0xff]  ;;  %s815_s15 = scalar_lea.hbm %s1838_s2, %s1117_s27  ;;  %s835_s26 = scalar_lea.hbm %s1839_s3, %s1117_s27 }
  0x30   : > { %v244_v7 = vld [vmem:[%s1536_s0 + $0x18] sm:$0xff]  ;;  %v245_v9 = vld [vmem:[%s1536_s0 + $0x20] sm:$0xff]  ;;  %v262_v10 = vld [vmem:[%s1536_s0 + $0xa8] sm:$0xff]  ;;  %s818_s28 = sshll.u32 %s815_s15, 4  ;;  %s836_s29 = sshll.u32 %s1671_s20, 4  ;;  %s819_s28 = int_to_ptr.hbm [resolvable:$true] %s818_s28  ;;  %s1782_s29 = int_to_ptr.vmem [resolvable:$true] %s836_s29 }
  0x31   : > { %v246_v11 = vld [vmem:[%s1536_s0 + $0x28] sm:$0xff]  ;;  %v263_v12 = vld [vmem:[%s1536_s0 + $0xb0] sm:$0xff]  ;;  %v264_v14 = vld [vmem:[%s1536_s0 + $0xb8] sm:$0xff]  ;;  %s838_s21 = sshll.u32 %s835_s26, 4  ;;  %s796_s30 = scalar_lea.sflag [#allocation6], %s1529_s6  ;;  %s1784_s21 = int_to_ptr.hbm [resolvable:$true] %s838_s21 }
  0x32   : > { %v247_v13 = vld [vmem:[%s1536_s0 + $0x30] sm:$0xff]  ;;  %v248_v15 = vld [vmem:[%s1536_s0 + $0x38] sm:$0xff]  ;;  %v265_v16 = vld [vmem:[%s1536_s0 + $0xc0] sm:$0xff]  ;;  %s1293_s4 = sshra.s32 %s819_s28, 4  ;;  %s1294_s4 = int_to_ptr.hbm [resolvable:$true] %s1293_s4 }
  0x33   : > { %v249_v17 = vld [vmem:[%s1536_s0 + $0x40] sm:$0xff]  ;;  %v266_v18 = vld [vmem:[%s1536_s0 + $0xc8] sm:$0xff]  ;;  %v267_v20 = vld [vmem:[%s1536_s0 + $0xd0] sm:$0xff]  ;;  %s1295_s7 = scalar_lea.hbm %s1294_s4, 256  ;;  %p1300_p10 = scmp.lt.s32.totalorder %s1294_s4, %s1838_s2 }
  0x34   : > { %v250_v19 = vld [vmem:[%s1536_s0 + $0x48] sm:$0xff]  ;;  %v251_v21 = vld [vmem:[%s1536_s0 + $0x50] sm:$0xff]  ;;  %v268_v22 = vld [vmem:[%s1536_s0 + $0xd8] sm:$0xff]  ;;  %p1296_p1 = scmp.ne.s32.totalorder %s1294_s4, %s1295_s7 }
  0x35   : > { %v252_v23 = vld [vmem:[%s1536_s0 + $0x58] sm:$0xff]  ;;  %v269_v24 = vld [vmem:[%s1536_s0 + $0xe0] sm:$0xff]  ;;  %v270_v26 = vld [vmem:[%s1536_s0 + $0xe8] sm:$0xff] }
  0x36   : > { %306 = vxpose.xlu1.b32.cont [2/16] %v258_v2, 128  ;;  %v253_v25 = vld [vmem:[%s1536_s0 + $0x60] sm:$0xff]  ;;  %v254_v27 = vld [vmem:[%s1536_s0 + $0x68] sm:$0xff]  ;;  %v271_v28 = vld [vmem:[%s1536_s0 + $0xf0] sm:$0xff]  ;;  %p1297_p4 = pnand %p1296_p1, %p1505_p5 }
  0x37   : > { %274 = vxpose.xlu0.b32.cont [2/16] %v242_v3, 128  ;;  %v255_v29 = vld [vmem:[%s1536_s0 + $0x70] sm:$0xff]  ;;  %v272_v30 = vld [vmem:[%s1536_s0 + $0xf8] sm:$0xff] }
  0x38   : > { %v256_v31 = vld [vmem:[%s1536_s0 + $0x78] sm:$0xff]  ;;  %p1298_p8 = pneg %p1297_p4 }
  0x3e   : > { %307 = vxpose.xlu1.b32.cont [3/16] %v259_v4, 128 }
  0x3f   : > { %275 = vxpose.xlu0.b32.cont [3/16] %v243_v5, 128 }
  0x46   : > { %308 = vxpose.xlu1.b32.cont [4/16] %v260_v6, 128 }
  0x47   : > { %276 = vxpose.xlu0.b32.cont [4/16] %v244_v7, 128 }
  0x4e   : > { %309 = vxpose.xlu1.b32.cont [5/16] %v261_v8, 128 }
  0x4f   : > { %277 = vxpose.xlu0.b32.cont [5/16] %v245_v9, 128 }
  0x56   : > { %310 = vxpose.xlu1.b32.cont [6/16] %v262_v10, 128 }
  0x57   : > { %278 = vxpose.xlu0.b32.cont [6/16] %v246_v11, 128 }
  0x5e   : > { %311 = vxpose.xlu1.b32.cont [7/16] %v263_v12, 128 }
  0x5f   : > { %279 = vxpose.xlu0.b32.cont [7/16] %v247_v13, 128 }
  0x66   : > { %312 = vxpose.xlu1.b32.cont [8/16] %v264_v14, 128 }
  0x67   : > { %280 = vxpose.xlu0.b32.cont [8/16] %v248_v15, 128 }
  0x6e   : > { %313 = vxpose.xlu1.b32.cont [9/16] %v265_v16, 128 }
  0x6f   : > { %281 = vxpose.xlu0.b32.cont [9/16] %v249_v17, 128 }
  0x76   : > { %314 = vxpose.xlu1.b32.cont [10/16] %v266_v18, 128 }
  0x77   : > { %282 = vxpose.xlu0.b32.cont [10/16] %v250_v19, 128 }
  0x7e   : > { %315 = vxpose.xlu1.b32.cont [11/16] %v267_v20, 128 }
  0x7f   : > { %283 = vxpose.xlu0.b32.cont [11/16] %v251_v21, 128 }
  0x86   : > { %316 = vxpose.xlu1.b32.cont [12/16] %v268_v22, 128 }
  0x87   : > { %284 = vxpose.xlu0.b32.cont [12/16] %v252_v23, 128 }
  0x8e   : > { %317 = vxpose.xlu1.b32.cont [13/16] %v269_v24, 128 }
  0x8f   : > { %285 = vxpose.xlu0.b32.cont [13/16] %v253_v25, 128 }
  0x96   : > { %318 = vxpose.xlu1.b32.cont [14/16] %v270_v26, 128 }
  0x97   : > { %286 = vxpose.xlu0.b32.cont [14/16] %v254_v27, 128 }
  0x9e   : > { %319 = vxpose.xlu1.b32.cont [15/16] %v271_v28, 128 }
  0x9f   : > { %287 = vxpose.xlu0.b32.cont [15/16] %v255_v29, 128 }
  0xa6   : > { %320 = vxpose.xlu1.b32.end [16/16] %v272_v30, 128 }
  0xa7   : > { %288 = vxpose.xlu0.b32.end [16/16] %v256_v31, 128 }
  0xd2   : > { %v1574_v32 = vpop.trf.xlu1 }
  0xd3   : > { %v1576_v33 = vpop.trf.xlu0 }
  0xd4   : > { %v369_v34 = vpack.c.bf16 %v1574_v32, %v1576_v33 }
  0xd6   : > { %385 = vst [vmem:[#allocation3] sm:$0xff] %v369_v34 }
  0xda   : > { %v1580_v35 = vpop.trf.xlu1 }
  0xdb   : > { %v1582_v36 = vpop.trf.xlu0 }
  0xdc   : > { %v370_v37 = vpack.c.bf16 %v1580_v35, %v1582_v36 }
  0xde   : > { %386 = vst [vmem:[#allocation3 + $0x8] sm:$0xff] %v370_v37 }
  0xe2   : > { %v1586_v38 = vpop.trf.xlu1 }
  0xe3   : > { %v1588_v39 = vpop.trf.xlu0 }
  0xe4   : > { %v371_v40 = vpack.c.bf16 %v1586_v38, %v1588_v39 }
  0xe6   : > { %387 = vst [vmem:[#allocation3 + $0x10] sm:$0xff] %v371_v40 }
  0xea   : > { %v1592_v41 = vpop.trf.xlu1 }
  0xeb   : > { %v1594_v42 = vpop.trf.xlu0 }
  0xec   : > { %v372_v43 = vpack.c.bf16 %v1592_v41, %v1594_v42 }
  0xee   : > { %388 = vst [vmem:[#allocation3 + $0x18] sm:$0xff] %v372_v43 }
  0xf2   : > { %v1598_v44 = vpop.trf.xlu1 }
  0xf3   : > { %v1600_v45 = vpop.trf.xlu0 }
  0xf4   : > { %v373_v46 = vpack.c.bf16 %v1598_v44, %v1600_v45 }
  0xf6   : > { %389 = vst [vmem:[#allocation3 + $0x20] sm:$0xff] %v373_v46 }
  0xfa   : > { %v1604_v47 = vpop.trf.xlu1 }
  0xfb   : > { %v1606_v48 = vpop.trf.xlu0 }
  0xfc   : > { %v374_v49 = vpack.c.bf16 %v1604_v47, %v1606_v48 }
  0xfe   : > { %390 = vst [vmem:[#allocation3 + $0x28] sm:$0xff] %v374_v49 }
 0x102   : > { %v1610_v50 = vpop.trf.xlu1 }
 0x103   : > { %v1612_v51 = vpop.trf.xlu0 }
 0x104   : > { %v375_v52 = vpack.c.bf16 %v1610_v50, %v1612_v51 }
 0x106   : > { %391 = vst [vmem:[#allocation3 + $0x30] sm:$0xff] %v375_v52 }
 0x10a   : > { %v1616_v53 = vpop.trf.xlu1 }
 0x10b   : > { %v1618_v54 = vpop.trf.xlu0 }
 0x10c   : > { %v376_v55 = vpack.c.bf16 %v1616_v53, %v1618_v54 }
 0x10e   : > { %392 = vst [vmem:[#allocation3 + $0x38] sm:$0xff] %v376_v55 }
 0x112   : > { %v1622_v56 = vpop.trf.xlu1 }
 0x113   : > { %v1624_v57 = vpop.trf.xlu0 }
 0x114   : > { %v377_v58 = vpack.c.bf16 %v1622_v56, %v1624_v57 }
 0x116   : > { %393 = vst [vmem:[#allocation3 + $0x40] sm:$0xff] %v377_v58  ;;  %v1108_v58 = vld [vmem:[#allocation3 + $0x34] sm:$0xf0] }
 0x11a   : > { %v1628_v59 = vpop.trf.xlu1 }
 0x11b   : > { %v1630_v60 = vpop.trf.xlu0 }
 0x11c   : > { %v378_v61 = vpack.c.bf16 %v1628_v59, %v1630_v60 }
 0x11d   : > { %v1054_v46 = vld [vmem:[#allocation3 + $0x40] sm:$0xf]  ;;  %v1109_v52 = vld [vmem:[#allocation3 + $0x44] sm:$0xf] }
 0x11e   : > { %394 = vst [vmem:[#allocation3 + $0x48] sm:$0xff] %v378_v61  ;;  %v1048_v61 = vld [vmem:[#allocation3 + $0x38] sm:$0xf0] }
 0x122   : > { %v1634_v62 = vpop.trf.xlu1 }
 0x123   : > { %v1636_v63 = vpop.trf.xlu0 }
 0x124   : > { %v379_v0 = vpack.c.bf16 %v1634_v62, %v1636_v63 }
 0x125   : > { %v1110_v40 = vld [vmem:[#allocation3 + $0x44] sm:$0xf0]  ;;  %v1056_v43 = vld [vmem:[#allocation3 + $0x48] sm:$0xf0] }
 0x126   : > { %395 = vst [vmem:[#allocation3 + $0x50] sm:$0xff] %v379_v0  ;;  %v1055_v49 = vor.u32 %v1110_v40, %v1054_v46  ;;  %v1059_v55 = vor.u32 %v1109_v52, %v1056_v43  ;;  %v1046_v0 = vld [vmem:[#allocation3 + $0x30] sm:$0xf]  ;;  %v1094_v40 = vld [vmem:[#allocation4 + $0x8] sm:$0xff]  ;;  %v1096_v52 = vld [vmem:[#allocation4 + $0x18] sm:$0xff] }
 0x127   : > { %v1098_v43 = vld [vmem:[#allocation4 + $0x28] sm:$0xff]  ;;  %v1095_v46 = vld [vmem:[#allocation4 + $0x10] sm:$0xff] }
 0x12a   : > { %v1640_v1 = vpop.trf.xlu1 }
 0x12b   : > { %v1642_v2 = vpop.trf.xlu0 }
 0x12c   : > { %v380_v3 = vpack.c.bf16 %v1640_v1, %v1642_v2 }
 0x12d   : > { %v1062_v30 = vld [vmem:[#allocation3 + $0x50] sm:$0xf]  ;;  %v1111_v34 = vld [vmem:[#allocation3 + $0x54] sm:$0xf] }
 0x12e   : > { %396 = vst [vmem:[#allocation3 + $0x58] sm:$0xff] %v380_v3  ;;  %v1047_v3 = vor.u32 %v1108_v58, %v1046_v0 }
 0x132   : > { %v1646_v4 = vpop.trf.xlu1 }
 0x133   : > { %v1648_v5 = vpop.trf.xlu0 }
 0x134   : > { %v381_v6 = vpack.c.bf16 %v1646_v4, %v1648_v5 }
 0x135   : > { %v1112_v28 = vld [vmem:[#allocation3 + $0x54] sm:$0xf0]  ;;  %v1064_v29 = vld [vmem:[#allocation3 + $0x58] sm:$0xf0] }
 0x136   : > { %397 = vst [vmem:[#allocation3 + $0x60] sm:$0xff] %v381_v6  ;;  %v1063_v31 = vor.u32 %v1112_v28, %v1062_v30  ;;  %v1067_v37 = vor.u32 %v1111_v34, %v1064_v29  ;;  %v1107_v6 = vld [vmem:[#allocation3 + $0x34] sm:$0xf]  ;;  %v1022_v28 = vld [vmem:[#allocation3] sm:$0xf] }
 0x137   : > { %v1101_v30 = vld [vmem:[#allocation3 + $0x4] sm:$0xf] }
 0x138   : > { %v1093_v34 = vld [vmem:[#allocation4] sm:$0xff] }
 0x13a   : > { %v1652_v7 = vpop.trf.xlu1 }
 0x13b   : > { %v1654_v8 = vpop.trf.xlu0 }
 0x13c   : > { %v382_v9 = vpack.c.bf16 %v1652_v7, %v1654_v8 }
 0x13d   : > { %v1070_v24 = vld [vmem:[#allocation3 + $0x60] sm:$0xf]  ;;  %v1113_v26 = vld [vmem:[#allocation3 + $0x64] sm:$0xf] }
 0x13e   : > { %398 = vst [vmem:[#allocation3 + $0x68] sm:$0xff] %v382_v9  ;;  %v1051_v9 = vor.u32 %v1107_v6, %v1048_v61 }
 0x142   : > { %v1658_v10 = vpop.trf.xlu1 }
 0x143   : > { %v1660_v11 = vpop.trf.xlu0 }
 0x144   : > { %v383_v12 = vpack.c.bf16 %v1658_v10, %v1660_v11 }
 0x145   : > { %v1114_v22 = vld [vmem:[#allocation3 + $0x64] sm:$0xf0]  ;;  %v1072_v23 = vld [vmem:[#allocation3 + $0x68] sm:$0xf0] }
 0x146   : > { %399 = vst [vmem:[#allocation3 + $0x70] sm:$0xff] %v383_v12  ;;  %v1071_v25 = vor.u32 %v1114_v22, %v1070_v24  ;;  %v1075_v27 = vor.u32 %v1113_v26, %v1072_v23  ;;  %v1106_v12 = vld [vmem:[#allocation3 + $0x24] sm:$0xf0]  ;;  %v1030_v22 = vld [vmem:[#allocation3 + $0x10] sm:$0xf] }
 0x147   : > { %v1103_v24 = vld [vmem:[#allocation3 + $0x14] sm:$0xf]  ;;  %v1102_v26 = vld [vmem:[#allocation3 + $0x4] sm:$0xf0] }
 0x148   : > { %v1023_v29 = vor.u32 %v1102_v26, %v1022_v28 }
 0x14a   : > { %v1664_v13 = vpop.trf.xlu1 }
 0x14b   : > { %v1666_v14 = vpop.trf.xlu0 }
 0x14c   : > { %v384_v15 = vpack.c.bf16 %v1664_v13, %v1666_v14 }
 0x14d   : > { %v1078_v16 = vld [vmem:[#allocation3 + $0x70] sm:$0xf]  ;;  %v1115_v18 = vld [vmem:[#allocation3 + $0x74] sm:$0xf] }
 0x14e   : > { %400 = vst [vmem:[#allocation3 + $0x78] sm:$0xff] %v384_v15  ;;  %v1040_v15 = vld [vmem:[#allocation3 + $0x28] sm:$0xf0] }
 0x155   : > { %v1116_v17 = vld [vmem:[#allocation3 + $0x74] sm:$0xf0]  ;;  %v1080_v19 = vld [vmem:[#allocation3 + $0x78] sm:$0xf0] }
 0x156   : > { %v1079_v20 = vor.u32 %v1116_v17, %v1078_v16  ;;  %v1083_v21 = vor.u32 %v1115_v18, %v1080_v19  ;;  %v1038_v16 = vld [vmem:[#allocation3 + $0x20] sm:$0xf]  ;;  %v1105_v18 = vld [vmem:[#allocation3 + $0x24] sm:$0xf] }
 0x157   : > { %v1039_v17 = vor.u32 %v1106_v12, %v1038_v16  ;;  %v1043_v19 = vor.u32 %v1105_v18, %v1040_v15 }
 0x158   : > { %566 = vmatpush.bf16.msra.mxu0 %v1079_v20  ;;  %1119 = vmatpush.bf16.msra.mxu2 %v1079_v20  ;;  %v1104_v20 = vld [vmem:[#allocation3 + $0x14] sm:$0xf0] }
 0x159   : > { %615 = vmatpush.bf16.msra.mxu1 %v1083_v21  ;;  %1127 = vmatpush.bf16.msra.mxu3 %v1083_v21  ;;  %v1032_v21 = vld [vmem:[#allocation3 + $0x18] sm:$0xf0]  ;;  %v1031_v23 = vor.u32 %v1104_v20, %v1030_v22 }
 0x15c   : > { %567 = vmatpush.bf16.msra.mxu0 %v1071_v25  ;;  %1120 = vmatpush.bf16.msra.mxu2 %v1071_v25  ;;  %v1035_v25 = vor.u32 %v1103_v24, %v1032_v21 }
 0x15d   : > { %616 = vmatpush.bf16.msra.mxu1 %v1075_v27  ;;  %1128 = vmatpush.bf16.msra.mxu3 %v1075_v27  ;;  %v1024_v27 = vld [vmem:[#allocation3 + $0x8] sm:$0xf0] }
 0x160   : > { %568 = vmatpush.bf16.msra.mxu0 %v1063_v31  ;;  %1121 = vmatpush.bf16.msra.mxu2 %v1063_v31  ;;  %v1027_v31 = vor.u32 %v1101_v30, %v1024_v27 }
 0x161   : > { %617 = vmatpush.bf16.msra.mxu1 %v1067_v37  ;;  %1129 = vmatpush.bf16.msra.mxu3 %v1067_v37  ;;  %v1097_v37 = vld [vmem:[#allocation4 + $0x20] sm:$0xff] }
 0x164   : > { %569 = vmatpush.bf16.msra.mxu0 %v1055_v49  ;;  %1122 = vmatpush.bf16.msra.mxu2 %v1055_v49  ;;  %v1099_v49 = vld [vmem:[#allocation4 + $0x30] sm:$0xff] }
 0x165   : > { %618 = vmatpush.bf16.msra.mxu1 %v1059_v55  ;;  %1130 = vmatpush.bf16.msra.mxu3 %v1059_v55  ;;  %v1100_v55 = vld [vmem:[#allocation4 + $0x38] sm:$0xff] }
 0x168   : > { %570 = vmatpush.bf16.msra.mxu0 %v1047_v3  ;;  %1123 = vmatpush.bf16.msra.mxu2 %v1047_v3 }
 0x169   : > { %619 = vmatpush.bf16.msra.mxu1 %v1051_v9  ;;  %1131 = vmatpush.bf16.msra.mxu3 %v1051_v9 }
 0x16c   : > { %571 = vmatpush.bf16.msra.mxu0 %v1039_v17  ;;  %1124 = vmatpush.bf16.msra.mxu2 %v1039_v17 }
 0x16d   : > { %620 = vmatpush.bf16.msra.mxu1 %v1043_v19  ;;  %1132 = vmatpush.bf16.msra.mxu3 %v1043_v19 }
 0x170   : > { %572 = vmatpush.bf16.msra.mxu0 %v1031_v23  ;;  %1125 = vmatpush.bf16.msra.mxu2 %v1031_v23 }
 0x171   : > { %621 = vmatpush.bf16.msra.mxu1 %v1035_v25  ;;  %1133 = vmatpush.bf16.msra.mxu3 %v1035_v25 }
 0x174   : > { %573 = vmatpush.bf16.msra.mxu0 %v1023_v29  ;;  %1126 = vmatpush.bf16.msra.mxu2 %v1023_v29 }
 0x175   : > { %622 = vmatpush.bf16.msra.mxu1 %v1027_v31  ;;  %1134 = vmatpush.bf16.msra.mxu3 %v1027_v31 }
 0x177   : > { %574 = vmatmul.bf16.vlgmr.msra.gmra.mxu0 %v1093_v34  ;;  %594 = vmatmul.bf16.vlgmr.msra.gmra.mxu2 %v1097_v37 }
 0x178   : > { %623 = vmatmul.bf16.vlgmr.msra.gmra.mxu1 %v1093_v34  ;;  %643 = vmatmul.bf16.vlgmr.msra.gmra.mxu3 %v1097_v37 }
 0x187   : > { %579 = vmatmul.bf16.gmra.mxu0 %v1094_v40  ;;  %599 = vmatmul.bf16.gmra.mxu2 %v1098_v43 }
 0x188   : > { %628 = vmatmul.bf16.gmra.mxu1 %v1094_v40  ;;  %648 = vmatmul.bf16.gmra.mxu3 %v1098_v43 }
 0x197   : > { %584 = vmatmul.bf16.gmra.mxu0 %v1095_v46  ;;  %604 = vmatmul.bf16.gmra.mxu2 %v1099_v49 }
 0x198   : > { %633 = vmatmul.bf16.gmra.mxu1 %v1095_v46  ;;  %653 = vmatmul.bf16.gmra.mxu3 %v1099_v49 }
 0x1a7   : > { %589 = vmatmul.bf16.gmra.mxu0 %v1096_v52  ;;  %609 = vmatmul.bf16.gmra.mxu2 %v1100_v55 }
 0x1a8   : > { %638 = vmatmul.bf16.gmra.mxu1 %v1096_v52  ;;  %658 = vmatmul.bf16.gmra.mxu3 %v1100_v55 }
 0x1f4   : > { %v575_v58 = vpop.f32.mrf.mxu0 }
 0x1f5   : > { %664 = vst [vmem:[%s1671_s20] sm:$0xff] %v575_v58  ;;  %v731_v61 = vsub.f32 %v1576_v33, %v575_v58  ;;  %v624_v0 = vpop.f32.mrf.mxu1 }
 0x1f6   : > { %665 = vst [vmem:[%s1671_s20 + $0x8] sm:$0xff] %v624_v0  ;;  %v732_v3 = vsub.f32 %v1574_v32, %v624_v0 }
 0x1f7   : > { %763 = vst [vmem:[%s1678_s22] sm:$0xff] %v731_v61 }
 0x1f8   : > { %764 = vst [vmem:[%s1678_s22 + $0x8] sm:$0xff] %v732_v3 }
 0x1fa   : > { %v595_v6 = vpop.f32.mrf.mxu2 }
 0x1fb   : > { %680 = vst [vmem:[%s1671_s20 + $0x80] sm:$0xff] %v595_v6  ;;  %v747_v33 = vsub.f32 %v1624_v57, %v595_v6  ;;  %v644_v9 = vpop.f32.mrf.mxu3 }
 0x1fc   : > { %681 = vst [vmem:[%s1671_s20 + $0x88] sm:$0xff] %v644_v9  ;;  %v748_v32 = vsub.f32 %v1622_v56, %v644_v9  ;;  %v577_v12 = vpop.f32.mrf.mxu0 }
 0x1fd   : > { %779 = vst [vmem:[%s1678_s22 + $0x80] sm:$0xff] %v747_v33  ;;  %v733_v15 = vsub.f32 %v1582_v36, %v577_v12  ;;  %v626_v16 = vpop.f32.mrf.mxu1 }
 0x1fe   : > { %780 = vst [vmem:[%s1678_s22 + $0x88] sm:$0xff] %v748_v32  ;;  %v734_v17 = vsub.f32 %v1580_v35, %v626_v16 }
 0x1ff   : > { %666 = vst [vmem:[%s1671_s20 + $0x10] sm:$0xff] %v577_v12 }
 0x200   : > { %765 = vst [vmem:[%s1678_s22 + $0x10] sm:$0xff] %v733_v15 }
 0x201   : > { %667 = vst [vmem:[%s1671_s20 + $0x18] sm:$0xff] %v626_v16 }
 0x202   : > { %766 = vst [vmem:[%s1678_s22 + $0x18] sm:$0xff] %v734_v17  ;;  %v597_v57 = vpop.f32.mrf.mxu2 }
 0x203   : > { %682 = vst [vmem:[%s1671_s20 + $0x90] sm:$0xff] %v597_v57  ;;  %v749_v56 = vsub.f32 %v1630_v60, %v597_v57  ;;  %v646_v18 = vpop.f32.mrf.mxu3 }
 0x204   : > { %683 = vst [vmem:[%s1671_s20 + $0x98] sm:$0xff] %v646_v18  ;;  %v750_v36 = vsub.f32 %v1628_v59, %v646_v18  ;;  %v580_v19 = vpop.f32.mrf.mxu0 }
 0x205   : > { %781 = vst [vmem:[%s1678_s22 + $0x90] sm:$0xff] %v749_v56  ;;  %v735_v35 = vsub.f32 %v1588_v39, %v580_v19  ;;  %v629_v20 = vpop.f32.mrf.mxu1 }
 0x206   : > { %782 = vst [vmem:[%s1678_s22 + $0x98] sm:$0xff] %v750_v36  ;;  %v736_v21 = vsub.f32 %v1586_v38, %v629_v20 }
 0x207   : > { %668 = vst [vmem:[%s1671_s20 + $0x20] sm:$0xff] %v580_v19 }
 0x208   : > { %767 = vst [vmem:[%s1678_s22 + $0x20] sm:$0xff] %v735_v35 }
 0x209   : > { %669 = vst [vmem:[%s1671_s20 + $0x28] sm:$0xff] %v629_v20 }
 0x20a   : > { %768 = vst [vmem:[%s1678_s22 + $0x28] sm:$0xff] %v736_v21  ;;  %v600_v60 = vpop.f32.mrf.mxu2 }
 0x20b   : > { %684 = vst [vmem:[%s1671_s20 + $0xa0] sm:$0xff] %v600_v60  ;;  %v751_v59 = vsub.f32 %v1636_v63, %v600_v60  ;;  %v649_v22 = vpop.f32.mrf.mxu3 }
 0x20c   : > { %685 = vst [vmem:[%s1671_s20 + $0xa8] sm:$0xff] %v649_v22  ;;  %v752_v39 = vsub.f32 %v1634_v62, %v649_v22  ;;  %v582_v23 = vpop.f32.mrf.mxu0 }
 0x20d   : > { %783 = vst [vmem:[%s1678_s22 + $0xa0] sm:$0xff] %v751_v59  ;;  %v737_v38 = vsub.f32 %v1594_v42, %v582_v23  ;;  %v631_v24 = vpop.f32.mrf.mxu1 }
 0x20e   : > { %784 = vst [vmem:[%s1678_s22 + $0xa8] sm:$0xff] %v752_v39  ;;  %v738_v25 = vsub.f32 %v1592_v41, %v631_v24 }
 0x20f   : > { %670 = vst [vmem:[%s1671_s20 + $0x30] sm:$0xff] %v582_v23 }
 0x210   : > { %769 = vst [vmem:[%s1678_s22 + $0x30] sm:$0xff] %v737_v38 }
 0x211   : > { %671 = vst [vmem:[%s1671_s20 + $0x38] sm:$0xff] %v631_v24 }
 0x212   : > { %770 = vst [vmem:[%s1678_s22 + $0x38] sm:$0xff] %v738_v25  ;;  %v602_v63 = vpop.f32.mrf.mxu2 }
 0x213   : > { %686 = vst [vmem:[%s1671_s20 + $0xb0] sm:$0xff] %v602_v63  ;;  %v753_v62 = vsub.f32 %v1642_v2, %v602_v63  ;;  %v651_v26 = vpop.f32.mrf.mxu3 }
 0x214   : > { %687 = vst [vmem:[%s1671_s20 + $0xb8] sm:$0xff] %v651_v26  ;;  %v754_v42 = vsub.f32 %v1640_v1, %v651_v26  ;;  %v585_v27 = vpop.f32.mrf.mxu0 }
 0x215   : > { %785 = vst [vmem:[%s1678_s22 + $0xb0] sm:$0xff] %v753_v62  ;;  %v739_v41 = vsub.f32 %v1600_v45, %v585_v27  ;;  %v634_v28 = vpop.f32.mrf.mxu1 }
 0x216   : > { %786 = vst [vmem:[%s1678_s22 + $0xb8] sm:$0xff] %v754_v42  ;;  %v740_v29 = vsub.f32 %v1598_v44, %v634_v28 }
 0x217   : > { %672 = vst [vmem:[%s1671_s20 + $0x40] sm:$0xff] %v585_v27 }
 0x218   : > { %771 = vst [vmem:[%s1678_s22 + $0x40] sm:$0xff] %v739_v41 }
 0x219   : > { %673 = vst [vmem:[%s1671_s20 + $0x48] sm:$0xff] %v634_v28 }
 0x21a   : > { %772 = vst [vmem:[%s1678_s22 + $0x48] sm:$0xff] %v740_v29  ;;  %v605_v2 = vpop.f32.mrf.mxu2 }
 0x21b   : > { %688 = vst [vmem:[%s1671_s20 + $0xc0] sm:$0xff] %v605_v2  ;;  %v755_v1 = vsub.f32 %v1648_v5, %v605_v2  ;;  %v654_v30 = vpop.f32.mrf.mxu3 }
 0x21c   : > { %689 = vst [vmem:[%s1671_s20 + $0xc8] sm:$0xff] %v654_v30  ;;  %v756_v45 = vsub.f32 %v1646_v4, %v654_v30  ;;  %v587_v31 = vpop.f32.mrf.mxu0 }
 0x21d   : > { %787 = vst [vmem:[%s1678_s22 + $0xc0] sm:$0xff] %v755_v1  ;;  %v741_v44 = vsub.f32 %v1606_v48, %v587_v31  ;;  %v636_v34 = vpop.f32.mrf.mxu1 }
 0x21e   : > { %788 = vst [vmem:[%s1678_s22 + $0xc8] sm:$0xff] %v756_v45  ;;  %v742_v37 = vsub.f32 %v1604_v47, %v636_v34 }
 0x21f   : > { %674 = vst [vmem:[%s1671_s20 + $0x50] sm:$0xff] %v587_v31 }
 0x220   : > { %773 = vst [vmem:[%s1678_s22 + $0x50] sm:$0xff] %v741_v44 }
 0x221   : > { %675 = vst [vmem:[%s1671_s20 + $0x58] sm:$0xff] %v636_v34 }
 0x222   : > { %774 = vst [vmem:[%s1678_s22 + $0x58] sm:$0xff] %v742_v37  ;;  %v607_v5 = vpop.f32.mrf.mxu2 }
 0x223   : > { %690 = vst [vmem:[%s1671_s20 + $0xd0] sm:$0xff] %v607_v5  ;;  %v757_v4 = vsub.f32 %v1654_v8, %v607_v5  ;;  %v656_v48 = vpop.f32.mrf.mxu3 }
 0x224   : > { %691 = vst [vmem:[%s1671_s20 + $0xd8] sm:$0xff] %v656_v48  ;;  %v758_v40 = vsub.f32 %v1652_v7, %v656_v48  ;;  %v590_v47 = vpop.f32.mrf.mxu0 }
 0x225   : > { %789 = vst [vmem:[%s1678_s22 + $0xd0] sm:$0xff] %v757_v4  ;;  %v743_v43 = vsub.f32 %v1612_v51, %v590_v47  ;;  %v639_v46 = vpop.f32.mrf.mxu1 }
 0x226   : > { %790 = vst [vmem:[%s1678_s22 + $0xd8] sm:$0xff] %v758_v40  ;;  %v744_v49 = vsub.f32 %v1610_v50, %v639_v46 }
 0x227   : > { %676 = vst [vmem:[%s1671_s20 + $0x60] sm:$0xff] %v590_v47 }
 0x228   : > { %775 = vst [vmem:[%s1678_s22 + $0x60] sm:$0xff] %v743_v43 }
 0x229   : > { %677 = vst [vmem:[%s1671_s20 + $0x68] sm:$0xff] %v639_v46 }
 0x22a   : > { %776 = vst [vmem:[%s1678_s22 + $0x68] sm:$0xff] %v744_v49  ;;  %v610_v8 = vpop.f32.mrf.mxu2 }
 0x22b   : > { %692 = vst [vmem:[%s1671_s20 + $0xe0] sm:$0xff] %v610_v8  ;;  %v759_v7 = vsub.f32 %v1660_v11, %v610_v8  ;;  %v659_v51 = vpop.f32.mrf.mxu3 }
 0x22c   : > { %693 = vst [vmem:[%s1671_s20 + $0xe8] sm:$0xff] %v659_v51  ;;  %v760_v52 = vsub.f32 %v1658_v10, %v659_v51  ;;  %v592_v50 = vpop.f32.mrf.mxu0 }
 0x22d   : > { %791 = vst [vmem:[%s1678_s22 + $0xe0] sm:$0xff] %v759_v7  ;;  %v745_v55 = vsub.f32 %v1618_v54, %v592_v50  ;;  %v641_v58 = vpop.f32.mrf.mxu1 }
 0x22e   : > { %792 = vst [vmem:[%s1678_s22 + $0xe8] sm:$0xff] %v760_v52  ;;  %v746_v11 = vsub.f32 %v1616_v53, %v641_v58 }
 0x22f   : > { %678 = vst [vmem:[%s1671_s20 + $0x70] sm:$0xff] %v592_v50 }
 0x230   : > { %777 = vst [vmem:[%s1678_s22 + $0x70] sm:$0xff] %v745_v55 }
 0x231   : > { %679 = vst [vmem:[%s1671_s20 + $0x78] sm:$0xff] %v641_v58 }
 0x232   : > { %778 = vst [vmem:[%s1678_s22 + $0x78] sm:$0xff] %v746_v11  ;;  %v612_v54 = vpop.f32.mrf.mxu2 }
 0x233   : > { %694 = vst [vmem:[%s1671_s20 + $0xf0] sm:$0xff] %v612_v54  ;;  %v761_v53 = vsub.f32 %v1666_v14, %v612_v54  ;;  %v661_v10 = vpop.f32.mrf.mxu3 }
 0x234   : > { %695 = vst [vmem:[%s1671_s20 + $0xf8] sm:$0xff] %v661_v10  ;;  %v762_v61 = vsub.f32 %v1664_v13, %v661_v10  ;;  %s1299_s20 = scalar_lea.hbm %s1838_s2, 512 }
 0x235   : > { %793 = vst [vmem:[%s1678_s22 + $0xf0] sm:$0xff] %v761_v53  ;;  %p1301_p12 = scmp.lt.s32.totalorder %s1299_s20, %s1295_s7 }
 0x236   : > { %794 = vst [vmem:[%s1678_s22 + $0xf8] sm:$0xff] %v762_v61 }
 0x237   : > { %p1302_p13 = por %p1301_p12, %p1300_p10 }
 0x239   : > { %p1303_p0 = pnand %p1302_p13, %p1298_p8 }
 0x23b   : > { %1306 = shalt.err (!%p1303_p0)
}
 0x23c   : > { %s1404_s22 = smov 256   ;;  %s1405_s11 = smov 16  }
 0x23d   : > { %1141 = dma.vmem_to_hbm [thread:$0]  (%p1505_p5), %s1773_s19, 4096, %s819_s28, %s796_s30, %s1404_s22, %s1404_s22, %s1405_s11  }
 0x23e   : > { %s801_s15 = scalar_lea.sflag [#allocation11], %s1529_s6  ;;  %s1321_s24 = sshra.s32 %s1784_s21, 4  ;;  %s1322_s24 = int_to_ptr.hbm [resolvable:$true] %s1321_s24 }
 0x23f   : > { %s1323_s25 = scalar_lea.hbm %s1322_s24, 256  ;;  %s1327_s7 = scalar_lea.hbm %s1839_s3, 512 }
 0x240   : > { %p1324_p3 = scmp.ne.s32.totalorder %s1322_s24, %s1323_s25  ;;  %p1328_p2 = scmp.lt.s32.totalorder %s1322_s24, %s1839_s3 }
 0x241   : > { %p1329_p1 = scmp.lt.s32.totalorder %s1327_s7, %s1323_s25 }
 0x242   : > { %p1325_p7 = pnand %p1324_p3, %p1505_p5 }
 0x243   : > { %p1330_p4 = por %p1329_p1, %p1328_p2 }
 0x244   : > { %p1326_p9 = pneg %p1325_p7 }
 0x246   : > { %p1331_p8 = pnand %p1330_p4, %p1326_p9 }
 0x248   : > { %1334 = shalt.err (!%p1331_p8)
}
 0x249   : > { %1142 = dma.vmem_to_hbm [thread:$0]  (%p1505_p5), %s1782_s29, 4096, %s1784_s21, %s801_s15, %s1404_s22, %s1404_s22, %s1405_s11  }
 0x24a PF: > { %s853_s6 = sand.u32 1, %s1377_s12   ;;  %p1154_p10 = pnand %p979_p11, %p1475_p6 }
 0x24b   : > { %s854_s19 = scalar_lea.sflag [#allocation6], %s853_s6 }
 0x24c   : > { %p1155_p12 = pneg %p1154_p10 }
 0x24e   : > { %1368 = dma.done.wait (%p1155_p12), %s854_s19, 4096  }
 0x24f   : > { %1370 = vsyncadd (%p1155_p12), %s854_s19, 4294963200  ;;  %s864_s28 = scalar_lea.sflag [#allocation11], %s853_s6 }
 0x250   : > { %1372 = dma.done.wait (%p1155_p12), %s864_s28, 4096  }
 0x251   : > { %1374 = vsyncadd (%p1155_p12), %s864_s28, 4294963200  ;;  %s24_s17 = sadd.s32 1, %s1397_s17   ;;  %s1849_s12 = smov %s1381_s13 }
 0x252   : > { %p21_p13 = scmp.ge.s32.totalorder %s24_s17, 4   ;;  %s1850_s13 = smov %s1385_s14 }
 0x253   : > { %s1851_s14 = smov %s1514_s18  ;;  %s1852_s15 = smov %s1393_s16 }
 0x254   : > { %s1853_s16 = smov %s1855_s5  ;;  %23 = sbr.rel (!%p21_p13) target bundleno = 11 (0xb), region = 101 }
 0x259   :  { %870 = vsyncpa [#allocation5], 1 }
 0x25a   :  { %872 = vsyncpa [#allocation5 + $0x1], 1 }
 0x25b   :  { %873 = vsyncpa [#allocation8], 1 }
 0x25c   :  { %875 = vsyncpa [#allocation8 + $0x1], 1 }
 0x25d   :  { %876 = vsyncpa [#allocation6], 1 }
 0x25e   :  { %878 = vsyncpa [#allocation6 + $0x1], 1 }
 0x25f   :  { %879 = vsyncpa [#allocation11], 1 }
 0x260   :  { %881 = vsyncpa [#allocation11 + $0x1], 1 }

</bundles_post_ra>
